<compile_context>
chip_gen: v6e
topology: v6e:2x2x1
jax: 0.10.0
libtpu: 0.0.40
codegen_flags: <defaults>
</compile_context>

<pallas_src>
import jax
import jax.numpy as jnp
from jax.experimental import pallas as pl
from jax.experimental.pallas import tpu as pltpu


def _make_kernel(total_rows, tile_r, needs_mask, use_weight):
    """Build the per-tile partial-sum kernel (closes over static config)."""

    def body(pred_ref, gt_ref, w_ref, out_ref):
        # pred_ref/gt_ref: (tile_r, HW); w_ref: (tile_r, 1); out_ref: (1,8,128) f32
        d = pred_ref[...].astype(jnp.float32) - gt_ref[...].astype(jnp.float32)
        # Reduce over HW per row first, then weight once per row (not per elem).
        row_sq = jnp.sum(d * d, axis=-1, keepdims=True)           # (tile_r, 1)
        if use_weight:
            w = w_ref[...].astype(jnp.float32)                     # (tile_r, 1)
            row_sq = row_sq * (w * w)
        if needs_mask:
            # Last row tile may extend past B*K rows; zero the padding rows.
            row = (pl.program_id(0) * tile_r
                   + jax.lax.broadcasted_iota(jnp.int32, (tile_r, 1), 0))
            row_sq = jnp.where(row < total_rows, row_sq, jnp.float32(0.0))
        partial = jnp.sum(row_sq)                                   # scalar f32
        out_ref[...] = jnp.broadcast_to(partial, out_ref.shape)

    if use_weight:
        return body
    return lambda pred_ref, gt_ref, out_ref: body(pred_ref, gt_ref, None, out_ref)


def _pick_tile_rows(num_rows, hw, itemsize, max_block_bytes=4 * 1024 * 1024):
    """Largest multiple-of-8 row tile keeping one input block <= ~4 MiB."""
    if num_rows <= 8:
        return int(num_rows)  # full-dim block (allowed even if < 8)
    cap = max(8, (max_block_bytes // max(1, hw * itemsize)) // 8 * 8)
    return int(min(2048, cap, (num_rows // 8) * 8))


def joints_mse_loss(output, target, target_weight, num_keypoints,
                    use_target_weight=True):
    """output/target: (B, K, H, W); target_weight: (B, K, 1). Returns scalar."""
    B, K, H, W = output.shape
    assert K == num_keypoints
    HW = H * W
    R = B * K

    pred = output.reshape(R, HW)        # contiguous reshape, no HBM copy
    gt = target.reshape(R, HW)

    itemsize = jnp.dtype(output.dtype).itemsize
    tile_r = _pick_tile_rows(R, HW, itemsize)
    num_tiles = pl.cdiv(R, tile_r)
    needs_mask = (R % tile_r) != 0

    in_specs = [
        pl.BlockSpec((tile_r, HW), lambda i: (i, 0)),
        pl.BlockSpec((tile_r, HW), lambda i: (i, 0)),
    ]
    args = [pred, gt]
    if use_target_weight:
        w = target_weight.reshape(R, 1)
        in_specs.append(pl.BlockSpec((tile_r, 1), lambda i: (i, 0)))
        args.append(w)

    kernel = _make_kernel(R, tile_r, needs_mask, use_target_weight)

    partials = pl.pallas_call(
        kernel,
        out_shape=jax.ShapeDtypeStruct((num_tiles, 8, 128), jnp.float32),
        grid_spec=pltpu.PrefetchScalarGridSpec(
            num_scalar_prefetch=0,
            grid=(num_tiles,),
            in_specs=in_specs,
            out_specs=pl.BlockSpec((1, 8, 128), lambda i: (i, 0, 0)),
        ),
        compiler_params=pltpu.CompilerParams(
            dimension_semantics=("parallel",),
            vmem_limit_bytes=48 * 1024 * 1024),
    )(*args)

    # Tiny final reduction + single global scale outside the kernel.
    scale = jnp.float32(0.5 / (num_keypoints * B * HW))
    return jnp.sum(partials[:, 0, 0]) * scale


def _reference_loss(output, target, target_weight, num_keypoints,
                    use_target_weight=True):
    # Pure-JAX mirror of the PyTorch forward.
    B, K, H, W = output.shape
    pred = output.reshape(B, K, -1)
    gt = target.reshape(B, K, -1)
    loss = 0.0
    for idx in range(num_keypoints):
        hp = pred[:, idx, :]
        hg = gt[:, idx, :]
        if use_target_weight:
            w = target_weight[:, idx]                # (B, 1)
            hp = hp * w
            hg = hg * w
        loss = loss + 0.5 * jnp.mean((hp - hg) ** 2)
    return loss / num_keypoints


if __name__ == "__main__":
    key = jax.random.PRNGKey(0)
    k1, k2, k3 = jax.random.split(key, 3)

    B, K, H, W = 2, 4, 16, 16
    output = jax.random.normal(k1, (B, K, H, W), dtype=jnp.float32)
    target = jax.random.normal(k2, (B, K, H, W), dtype=jnp.float32)
    target_weight = jax.random.uniform(k3, (B, K, 1), dtype=jnp.float32)

    # Weighted path (matches module default use_target_weight=True).
    loss = joints_mse_loss(output, target, target_weight, K,
                           use_target_weight=True)
    loss = jax.block_until_ready(loss)
    ref = _reference_loss(output, target, target_weight, K,
                          use_target_weight=True)
    assert jnp.allclose(loss, ref, rtol=1e-5, atol=1e-6), (loss, ref)

    # Unweighted path (skips the weight DMA/multiply entirely).
    loss_nw = joints_mse_loss(output, target, target_weight, K,
                              use_target_weight=False)
    loss_nw = jax.block_until_ready(loss_nw)
    ref_nw = _reference_loss(output, target, target_weight, K,
                             use_target_weight=False)
    assert jnp.allclose(loss_nw, ref_nw, rtol=1e-5, atol=1e-6), (loss_nw, ref_nw)

    print("KERNEL_OK")
</pallas_src>

<mosaic_0001>
module attributes {stable_mosaic.version = 11 : i64} {
  func.func @body(%arg0: i32, %arg1: memref<8x256xf32, #tpu.memory_space<vmem>>, %arg2: memref<8x256xf32, #tpu.memory_space<vmem>>, %arg3: memref<8x1xf32, #tpu.memory_space<vmem>>, %arg4: memref<1x8x128xf32, #tpu.memory_space<vmem>>) attributes {dimension_semantics = [#tpu.dimension_semantics<parallel>], iteration_bounds = array<i64: 1>, scalar_prefetch = 0 : i64, scratch_operands = 0 : i64, tpu.core_type = #tpu.core_type<tc>, window_params = [{transform_indices = @transform_0, window_bounds = array<i64: 8, 256>}, {transform_indices = @transform_1, window_bounds = array<i64: 8, 256>}, {transform_indices = @transform_2, window_bounds = array<i64: 8, 1>}, {transform_indices = @transform_3, window_bounds = array<i64: 1, 8, 128>}]} {
    %c0 = arith.constant 0 : index
    %c0_0 = arith.constant 0 : index
    %0 = vector.load %arg1[%c0, %c0_0] : memref<8x256xf32, #tpu.memory_space<vmem>>, vector<8x256xf32>
    %c0_1 = arith.constant 0 : index
    %c0_2 = arith.constant 0 : index
    %1 = vector.load %arg2[%c0_1, %c0_2] : memref<8x256xf32, #tpu.memory_space<vmem>>, vector<8x256xf32>
    %2 = arith.subf %0, %1 : vector<8x256xf32>
    %3 = arith.mulf %2, %2 : vector<8x256xf32>
    %cst = arith.constant dense<0.000000e+00> : vector<8xf32>
    %4 = vector.multi_reduction <add>, %3, %cst [1] : vector<8x256xf32> to vector<8xf32>
    %5 = vector.shape_cast %4 : vector<8xf32> to vector<8x1xf32>
    %c0_3 = arith.constant 0 : index
    %c0_4 = arith.constant 0 : index
    %6 = vector.load %arg3[%c0_3, %c0_4] : memref<8x1xf32, #tpu.memory_space<vmem>>, vector<8x1xf32>
    %7 = arith.mulf %6, %6 : vector<8x1xf32>
    %8 = arith.mulf %5, %7 : vector<8x1xf32>
    %9 = vector.shape_cast %8 : vector<8x1xf32> to vector<1x8x1xf32>
    %cst_5 = arith.constant dense<0.000000e+00> : vector<1xf32>
    %10 = vector.multi_reduction <add>, %9, %cst_5 [1, 2] : vector<1x8x1xf32> to vector<1xf32>
    %11 = vector.shape_cast %10 : vector<1xf32> to vector<1x1x1xf32>
    %12 = vector.extract %11[0, 0, 0] : f32 from vector<1x1x1xf32>
    %13 = vector.broadcast %12 : f32 to vector<1x8x128xf32>
    %c0_6 = arith.constant 0 : index
    %c0_7 = arith.constant 0 : index
    %c0_8 = arith.constant 0 : index
    %14 = vector.load %arg4[%c0_6, %c0_7, %c0_8] : memref<1x8x128xf32, #tpu.memory_space<vmem>>, vector<1x8x128xf32>
    tpu.vector_store %arg4[%c0_6, %c0_7, %c0_8], %13 {strides = array<i32>} : memref<1x8x128xf32, #tpu.memory_space<vmem>>, vector<1x8x128xf32>,
    return
  }
  func.func @transform_0(%arg0: i32) -> (i32, i32) {
    %c0_i32 = arith.constant 0 : i32
    %c0_i32_0 = arith.constant 0 : i32
    return %arg0, %c0_i32 : i32, i32
  }
  func.func @transform_1(%arg0: i32) -> (i32, i32) {
    %c0_i32 = arith.constant 0 : i32
    %c0_i32_0 = arith.constant 0 : i32
    return %arg0, %c0_i32 : i32, i32
  }
  func.func @transform_2(%arg0: i32) -> (i32, i32) {
    %c0_i32 = arith.constant 0 : i32
    %c0_i32_0 = arith.constant 0 : i32
    return %arg0, %c0_i32 : i32, i32
  }
  func.func @transform_3(%arg0: i32) -> (i32, i32, i32) {
    %c0_i32 = arith.constant 0 : i32
    %c0_i32_0 = arith.constant 0 : i32
    %c0_i32_1 = arith.constant 0 : i32
    return %arg0, %c0_i32, %c0_i32_0 : i32, i32, i32
  }
}

</mosaic_0001>

<bundles_post_ra>
// kernel: tpu_custom_call.1
= control target key start
LH: loop header
LB: loop body
LE: loop exit
PB: predicated region body
PF: predicated region fallthrough
CT: control target
= control target key end

     0   :  { %8 = vsyncpa [#allocation3], 0  ;;  %s188_s0 = inlined_call_operand.hbm [shape: f32[8,256], index: 0, kind: input, shape index: {}]   ;;  %s189_s1 = inlined_call_operand.hbm [shape: f32[8,256], index: 1, kind: input, shape index: {}]   ;;  %s190_s2 = inlined_call_operand.vmem [shape: f32[8,1], index: 2, kind: input, shape index: {}]   ;;  %s191_s3 = inlined_call_operand.hbm [shape: f32[1,8,128], index: 3, kind: output, shape index: {}]  }
   0x1   :  { %9 = vsyncpa [#allocation6], 0 }
   0x2   :  { %10 = vsyncpa [#allocation4], 0  ;;  %s153_s12 = smov [#allocation2]   ;;  %s154_s14 = smov [#allocation5]  }
   0x3   :  { %s17_s13 = sshll.u32 %s153_s12, 4  ;;  %s27_s15 = sshll.u32 %s154_s14, 4  ;;  %s18_s13 = int_to_ptr.vmem [resolvable:$true] %s17_s13  ;;  %s28_s15 = int_to_ptr.vmem [resolvable:$true] %s27_s15 }
   0x4   :  { %s95_s16 = scalar_lea.vmem %s18_s13, 256  ;;  %p100_p1 = scmp.lt.s32.totalorder %s18_s13, %s18_s13 }
   0x5   :  { %p96_p0 = scmp.ne.s32.totalorder %s18_s13, %s95_s16  ;;  %p101_p2 = scmp.lt.s32.totalorder %s95_s16, %s95_s16 }
   0x7   :  { %p102_p3 = por %p101_p2, %p100_p1 }
   0x9   :  { %p103_p4 = pnand %p102_p3, %p96_p0 }
   0xb   :  { %106 = shalt.err (!%p103_p4)
}
   0xc   :  { %20 = dma.hbm_to_vmem [thread:$0]  %s188_s0, 256, %s18_s13, [#allocation3]  }
   0xd   :  { %s115_s19 = scalar_lea.vmem %s28_s15, 256  ;;  %p120_p6 = scmp.lt.s32.totalorder %s28_s15, %s28_s15 }
   0xe   :  { %p116_p5 = scmp.ne.s32.totalorder %s28_s15, %s115_s19  ;;  %p121_p7 = scmp.lt.s32.totalorder %s115_s19, %s115_s19 }
  0x10   :  { %p122_p8 = por %p121_p7, %p120_p6 }
  0x12   :  { %p123_p9 = pnand %p122_p8, %p116_p5 }
  0x14   :  { %126 = shalt.err (!%p123_p9)
}
  0x15   :  { %30 = dma.hbm_to_vmem [thread:$0]  %s189_s1, 256, %s28_s15, [#allocation6]  }
  0x16   :  { %147 = dma.done.wait [#allocation3], 256  }
  0x17   :  { %148 = vsyncadd [#allocation3], 4294967040 }
  0x18   :  { %149 = dma.done.wait [#allocation6], 256  }
  0x19   :  { %150 = vsyncadd [#allocation6], 4294967040  ;;  %v39_v0 = vld [vmem:[#allocation2] sm:$0xff]  ;;  %v40_v1 = vld [vmem:[#allocation2 + $0x8] sm:$0xff]  ;;  %vm53_vm0 = vcmask 7168   ;;  %s155_s1 = smov [#allocation7]  }
  0x1a   :  { %v41_v2 = vld [vmem:[#allocation5] sm:$0xff]  ;;  %v42_v3 = vld [vmem:[#allocation5 + $0x8] sm:$0xff]  ;;  %v50_v9 = vld [vmem:[%s190_s2] sm:$0xff]  ;;  %s72_s23 = sshll.u32 %s155_s1, 4  ;;  %s73_s23 = int_to_ptr.vmem [resolvable:$true] %s72_s23 }
  0x1b   :  { %v43_v4 = vsub.f32 %v39_v0, %v41_v2  ;;  %v44_v5 = vsub.f32 %v40_v1, %v42_v3  ;;  %v51_v10 = vmul.f32 %v50_v9, %v50_v9  ;;  %s127_s2 = scalar_lea.vmem %s73_s23, 128  ;;  %p132_p11 = scmp.lt.s32.totalorder %s73_s23, %s73_s23 }
  0x1c   :  { %p128_p10 = scmp.ne.s32.totalorder %s73_s23, %s127_s2  ;;  %p133_p12 = scmp.lt.s32.totalorder %s127_s2, %s127_s2 }
  0x1d   :  { %v45_v6 = vmul.f32 %v43_v4, %v43_v4  ;;  %v46_v7 = vmul.f32 %v44_v5, %v44_v5 }
  0x1e   :  { %p134_p13 = por %p133_p12, %p132_p11 }
  0x1f   :  { %v47_v8 = vadd.f32 %v46_v7, %v45_v6 }
  0x20   :  { %p135_p0 = pnand %p134_p13, %p128_p10 }
  0x21   :  { %48 = vadd.xlane.f32.xlu0 %v47_v8 }
  0xaa   :  { %v49_v11 = vpop.xlane.xlu0 %48 }
  0xab   :  { %v52_v12 = vmul.f32 %v51_v10, %v49_v11 }
  0xad   :  { %v54_v13 = vsel %vm53_vm0, %v52_v12, 0.0 }
  0xae   :  { %55 = vadd.xlane.f32.xlu0 %v54_v13 }
 0x137   :  { %v56_v14 = vpop.xlane.xlu0 %55 }
 0x138   :  { %v57_v15 = vrot.slane %v56_v14, 4 }
 0x13a   :  { %v58_v16 = vadd.f32 %v57_v15, %v56_v14 }
 0x13c   :  { %v59_v17 = vrot.slane %v58_v16, 2 }
 0x13e   :  { %v60_v18 = vadd.f32 %v59_v17, %v58_v16 }
 0x140   :  { %v61_v19 = vrot.slane %v60_v18, 1 }
 0x142   :  { %v62_v20 = vadd.f32 %v61_v19, %v60_v18 }
 0x144   :  { %82 = vpush %v62_v20 }
 0x175   :  { %s83_s24 = spop %82 }
 0x176   :  { %v64_v21 = vstv %s83_s24 }
 0x177   :  { %65 = vst [vmem:[#allocation7] sm:$0xff] %v64_v21 }
 0x178   :  { %138 = shalt.err (!%p135_p0)
}
 0x179   :  { %75 = dma.vmem_to_hbm [thread:$0]  %s73_s23, 128, %s191_s3, [#allocation4]  }
 0x17a   :  { %151 = dma.done.wait [#allocation4], 128  }
 0x17b   :  { %152 = vsyncadd [#allocation4], 4294967168 }
 0x17c   :  { %79 = vsyncpa [#allocation3], 1 }
 0x17d   :  { %80 = vsyncpa [#allocation6], 1 }
 0x17e   :  { %81 = vsyncpa [#allocation4], 1 }

</bundles_post_ra>
